<compile_context>
chip_gen: v6e
topology: v6e:2x2x1
jax: 0.10.0
libtpu: 0.0.40
codegen_flags: <defaults>
</compile_context>

<pallas_src>
import math
import functools

import numpy as np
import jax
import jax.numpy as jnp
from jax import lax
from jax.experimental import pallas as pl
from jax.experimental.pallas import tpu as pltpu


def _tvmt_kernel(div_ref, phase_ref, o_ref, *, tile_t: int):
    # o_ref block is (C, TILE_T); div_ref / phase_ref are (C, 1) and broadcast
    # along lanes.  Single sin per element; phase = 0 (even ch -> sin) or
    # pi/2 (odd ch -> cos).
    base = pl.program_id(0) * tile_t
    pos = (base + lax.broadcasted_iota(jnp.int32, o_ref.shape, 1)).astype(jnp.float32)
    o_ref[...] = jnp.sin(pos * div_ref[...] + phase_ref[...])


def time_varying_meta_template(d_model: int, olen: int, ilen: int) -> jax.Array:
    """Returns the (2*d_model, olen) float32 TVMT tensor, computed in Pallas."""
    C = 2 * d_model

    # ---- trace-time (numpy) precompute of channel-only constants ----
    ks = np.arange(d_model, dtype=np.int64)
    k2 = ((ks // 2) * 2).astype(np.float64)                     # 0,0,2,2,4,4,...
    log1e4 = math.log(10000.0)
    div_ape = np.exp(-(k2 / float(d_model)) * log1e4)           # (d_model,)
    div_rpe = np.exp(-(k2 / float(ilen)) * log1e4)              # (d_model,)
    phase_h = np.where(ks % 2 == 0, 0.0, math.pi / 2.0)         # even->sin, odd->cos
    div_term = jnp.asarray(
        np.concatenate([div_ape, div_rpe]).astype(np.float32)[:, None])   # (C, 1)
    phase = jnp.asarray(
        np.concatenate([phase_h, phase_h]).astype(np.float32)[:, None])   # (C, 1)

    # ---- lane-dense tiling of the time axis ----
    # Largest multiple of 128 (capped at 2048) whose double-buffered output block
    # stays comfortably within VMEM on v5e/v6e/v7x (~4 MiB per buffer).
    vmem_budget_per_buf = 4 * 1024 * 1024
    max_tile = max(128, (vmem_budget_per_buf // (C * 4)) // 128 * 128)
    tile_t = min(2048, max_tile, 128 * pl.cdiv(olen, 128))      # multiple of 128
    olen_pad = tile_t * pl.cdiv(olen, tile_t)
    grid_t = olen_pad // tile_t

    kernel = functools.partial(_tvmt_kernel, tile_t=tile_t)
    out_padded = pl.pallas_call(
        kernel,
        out_shape=jax.ShapeDtypeStruct((C, olen_pad), jnp.float32),
        grid=(grid_t,),
        in_specs=[
            pl.BlockSpec((C, 1), lambda i: (0, 0)),             # div_term (resident)
            pl.BlockSpec((C, 1), lambda i: (0, 0)),             # phase    (resident)
        ],
        out_specs=pl.BlockSpec((C, tile_t), lambda i: (0, i)),
        compiler_params=pltpu.CompilerParams(
            dimension_semantics=("parallel",),
        ),
        cost_estimate=pl.CostEstimate(
            flops=2 * C * olen_pad,
            transcendentals=C * olen_pad,
            bytes_accessed=C * olen_pad * 4,
        ),
    )(div_term, phase)

    if olen_pad == olen:
        return out_padded
    return out_padded[:, :olen]


def _reference(d_model: int, olen: int, ilen: int) -> jax.Array:
    """Pure-JAX replica of the PyTorch forward for verification."""
    position = jnp.arange(olen, dtype=jnp.float32)[:, None]             # (olen, 1)
    ks = jnp.arange(0, d_model, 2, dtype=jnp.float32)                   # (d/2,)

    def build(denom):
        div = 1.0 / (10000.0 ** (ks / denom))                           # (d/2,)
        ang = position * div                                            # (olen, d/2)
        pe = jnp.zeros((olen, d_model), jnp.float32)
        pe = pe.at[:, 0::2].set(jnp.sin(ang))
        pe = pe.at[:, 1::2].set(jnp.cos(ang))
        return pe

    ape = build(float(d_model))
    rpe = build(float(ilen))
    return jnp.concatenate([ape, rpe], axis=1).T                        # (2d, olen)


if __name__ == "__main__":
    # Deterministic setup (module has no learned parameters; key for discipline only).
    _ = jax.random.PRNGKey(0)

    d_model = 32
    olen = 16   # output (target) length
    ilen = 8    # input (source) length

    out = time_varying_meta_template(d_model, olen, ilen)
    out = jax.block_until_ready(out)

    ref = _reference(d_model, olen, ilen)
    assert out.shape == (2 * d_model, olen), out.shape
    assert out.dtype == jnp.float32
    assert jnp.allclose(out, ref, atol=1e-5, rtol=1e-5), float(jnp.max(jnp.abs(out - ref)))

    print("KERNEL_OK")
</pallas_src>

<mosaic_0001>
module attributes {stable_mosaic.version = 11 : i64} {
  func.func @_tvmt_kernel(%arg0: i32, %arg1: memref<64x1xf32, #tpu.memory_space<vmem>>, %arg2: memref<64x1xf32, #tpu.memory_space<vmem>>, %arg3: memref<64x128xf32, #tpu.memory_space<vmem>>) attributes {dimension_semantics = [#tpu.dimension_semantics<parallel>], iteration_bounds = array<i64: 1>, scalar_prefetch = 0 : i64, scratch_operands = 0 : i64, tpu.core_type = #tpu.core_type<tc>, window_params = [{pipeline_mode = #tpu.pipeline_mode<synchronous>, transform_indices = @transform_0, window_bounds = array<i64: 64, 1>}, {pipeline_mode = #tpu.pipeline_mode<synchronous>, transform_indices = @transform_1, window_bounds = array<i64: 64, 1>}, {transform_indices = @transform_2, window_bounds = array<i64: 64, 128>}]} {
    %c128_i32 = arith.constant 128 : i32
    %0 = arith.muli %arg0, %c128_i32 : i32
    %1 = tpu.iota {dimensions = array<i32: 1>} : vector<64x128xi32>
    %2 = vector.broadcast %0 : i32 to vector<64x128xi32>
    %3 = arith.addi %2, %1 : vector<64x128xi32>
    %4 = arith.sitofp %3 : vector<64x128xi32> to vector<64x128xf32>
    %c0 = arith.constant 0 : index
    %c0_0 = arith.constant 0 : index
    %5 = vector.load %arg1[%c0, %c0_0] : memref<64x1xf32, #tpu.memory_space<vmem>>, vector<64x1xf32>
    %6 = vector.broadcast %5 : vector<64x1xf32> to vector<64x128xf32>
    %7 = arith.mulf %4, %6 : vector<64x128xf32>
    %c0_1 = arith.constant 0 : index
    %c0_2 = arith.constant 0 : index
    %8 = vector.load %arg2[%c0_1, %c0_2] : memref<64x1xf32, #tpu.memory_space<vmem>>, vector<64x1xf32>
    %9 = vector.broadcast %8 : vector<64x1xf32> to vector<64x128xf32>
    %10 = arith.addf %7, %9 : vector<64x128xf32>
    %11 = math.sin %10 : vector<64x128xf32>
    %c0_3 = arith.constant 0 : index
    %c0_4 = arith.constant 0 : index
    %12 = vector.load %arg3[%c0_3, %c0_4] : memref<64x128xf32, #tpu.memory_space<vmem>>, vector<64x128xf32>
    tpu.vector_store %arg3[%c0_3, %c0_4], %11 {strides = array<i32>} : memref<64x128xf32, #tpu.memory_space<vmem>>, vector<64x128xf32>,
    return
  }
  func.func @transform_0(%arg0: i32) -> (i32, i32) {
    %c0_i32 = arith.constant 0 : i32
    %c0_i32_0 = arith.constant 0 : i32
    %c0_i32_1 = arith.constant 0 : i32
    return %c0_i32, %c0_i32_0 : i32, i32
  }
  func.func @transform_1(%arg0: i32) -> (i32, i32) {
    %c0_i32 = arith.constant 0 : i32
    %c0_i32_0 = arith.constant 0 : i32
    %c0_i32_1 = arith.constant 0 : i32
    return %c0_i32, %c0_i32_0 : i32, i32
  }
  func.func @transform_2(%arg0: i32) -> (i32, i32) {
    %c0_i32 = arith.constant 0 : i32
    %c0_i32_0 = arith.constant 0 : i32
    return %c0_i32, %arg0 : i32, i32
  }
}

</mosaic_0001>

<bundles_post_ra>
// kernel: tpu_custom_call.1
= control target key start
LH: loop header
LB: loop body
LE: loop exit
PB: predicated region body
PF: predicated region fallthrough
CT: control target
= control target key end

     0   :  { %v1116_v2 = vmov 0   ;;  %s1736_s0 = inlined_call_operand.vmem [shape: f32[64,1], index: 0, kind: input, shape index: {}]   ;;  %s1737_s1 = inlined_call_operand.vmem [shape: f32[64,1], index: 1, kind: input, shape index: {}]   ;;  %s1738_s2 = inlined_call_operand.hbm [shape: f32[64,128], index: 2, kind: output, shape index: {}]  }
   0x1   :  { %v20_v0 = vld [vmem:[%s1736_s0 + $0x10] sm:$0xff]  ;;  %v18_v1 = vld [vmem:[%s1736_s0] sm:$0xff]  ;;  %1061 = vset.pattern.permute.xlu1 %v1116_v2  ;;  %1060 = vset.pattern.permute.xlu0 %v1116_v2  ;;  %v21_v3 = vld [vmem:[%s1736_s0 + $0x18] sm:$0xff] }
   0x2   :  { %38 = vperm.xlu1 %1061, %v20_v0   ;;  %28 = vperm.xlu0 %1060, %v18_v1   ;;  %v19_v4 = vld [vmem:[%s1736_s0 + $0x8] sm:$0xff] }
   0x3   :  { %7 = vsyncpa [#allocation3], 0  ;;  %v23_v5 = vld [vmem:[%s1736_s0 + $0x28] sm:$0xff]  ;;  %v22_v6 = vld [vmem:[%s1736_s0 + $0x20] sm:$0xff]  ;;  %v13_v17 = vlaneseq }
   0x4   :  { %v25_v7 = vld [vmem:[%s1736_s0 + $0x38] sm:$0xff]  ;;  %v24_v8 = vld [vmem:[%s1736_s0 + $0x30] sm:$0xff]  ;;  %v75_v9 = vld [vmem:[%s1737_s1 + $0x8] sm:$0xff] }
   0x5   :  { %v74_v10 = vld [vmem:[%s1737_s1] sm:$0xff]  ;;  %v77_v11 = vld [vmem:[%s1737_s1 + $0x18] sm:$0xff]  ;;  %v76_v12 = vld [vmem:[%s1737_s1 + $0x10] sm:$0xff]  ;;  %v14_v20 = vand.u32 127, %v13_v17  ;;  %v1121_v17 = vmov 920167782  }
   0x6   :  { %43 = vperm.xlu1 %1061, %v21_v3   ;;  %33 = vperm.xlu0 %1060, %v19_v4   ;;  %v79_v13 = vld [vmem:[%s1737_s1 + $0x28] sm:$0xff]  ;;  %v78_v14 = vld [vmem:[%s1737_s1 + $0x20] sm:$0xff]  ;;  %v81_v15 = vld [vmem:[%s1737_s1 + $0x38] sm:$0xff] }
   0x7   :  { %v80_v16 = vld [vmem:[%s1737_s1 + $0x30] sm:$0xff]  ;;  %v17_v23 = vcvt.s32.f32 %v14_v20  ;;  %s1123_s1 = smov [#allocation2]  }
   0x8   :  { %s975_s12 = sshll.u32 %s1123_s1, 4  ;;  %s976_s12 = int_to_ptr.vmem [resolvable:$true] %s975_s12 }
   0x9   :  { %s1094_s13 = scalar_lea.vmem %s976_s12, 1024  ;;  %p1099_p1 = scmp.lt.s32.totalorder %s976_s12, %s976_s12 }
   0xa   :  { %53 = vperm.xlu1 %1061, %v23_v5   ;;  %48 = vperm.xlu0 %1060, %v22_v6   ;;  %p1095_p0 = scmp.ne.s32.totalorder %s976_s12, %s1094_s13  ;;  %p1100_p2 = scmp.lt.s32.totalorder %s1094_s13, %s1094_s13 }
   0xc   :  { %p1101_p3 = por %p1100_p2, %p1099_p1 }
   0xe   :  { %63 = vperm.xlu1 %1061, %v25_v7   ;;  %58 = vperm.xlu0 %1060, %v24_v8   ;;  %v1117_v7 = vmov 683565275   ;;  %p1102_p4 = pnand %p1101_p3, %p1095_p0 }
  0x12   :  { %89 = vperm.xlu1 %1061, %v75_v9   ;;  %84 = vperm.xlu0 %1060, %v74_v10  }
  0x16   :  { %99 = vperm.xlu1 %1061, %v77_v11   ;;  %94 = vperm.xlu0 %1060, %v76_v12   ;;  %v1118_v11 = vmov 2475754826  }
  0x1a   :  { %109 = vperm.xlu1 %1061, %v79_v13   ;;  %104 = vperm.xlu0 %1060, %v78_v14   ;;  %v1119_v13 = vmov 2131351028  }
  0x1e   :  { %119 = vperm.xlu1 %1061, %v81_v15   ;;  %114 = vperm.xlu0 %1060, %v80_v16   ;;  %v1120_v15 = vmov 2102212464  }
  0x7d   :  { %v39_v18 = vpop.permute.xlu1 %38  ;;  %v29_v19 = vpop.permute.xlu0 %28 }
  0x7e   :  { %v66_v32 = vmul.f32 %v29_v19, %v17_v23  ;;  %v68_v59 = vmul.f32 %v39_v18, %v17_v23 }
  0x81   :  { %v44_v21 = vpop.permute.xlu1 %43  ;;  %v34_v22 = vpop.permute.xlu0 %33 }
  0x82   :  { %v67_v33 = vmul.f32 %v34_v22, %v17_v23  ;;  %v69_v38 = vmul.f32 %v44_v21, %v17_v23 }
  0x85   :  { %v54_v24 = vpop.permute.xlu1 %53  ;;  %v49_v25 = vpop.permute.xlu0 %48 }
  0x86   :  { %v1189_v26 = vmul.f32 %v54_v24, %v17_v23  ;;  %v1191_v27 = vmul.f32 %v49_v25, %v17_v23  ;;  %v1122_v24 = vmov 1326507024  }
  0x89   :  { %v64_v28 = vpop.permute.xlu1 %63  ;;  %v59_v29 = vpop.permute.xlu0 %58 }
  0x8a   :  { %v1193_v30 = vmul.f32 %v64_v28, %v17_v23  ;;  %v1195_v31 = vmul.f32 %v59_v29, %v17_v23 }
  0x8d   :  { %v90_v34 = vpop.permute.xlu1 %89  ;;  %v85_v35 = vpop.permute.xlu0 %84 }
  0x8e   :  { %v1197_v36 = vadd.f32 %v90_v34, %v67_v33  ;;  %v1199_v37 = vadd.f32 %v85_v35, %v66_v32 }
  0x90   :  { %v234_v39 = vand.u32 2147483647, %v1197_v36  ;;  %v237_v40 = vand.u32 2139095040, %v1197_v36  ;;  %v130_v41 = vand.u32 2147483647, %v1199_v37  ;;  %v133_v42 = vand.u32 2139095040, %v1199_v37 }
  0x91   :  { %v100_v43 = vpop.permute.xlu1 %99  ;;  %v95_v58 = vpop.permute.xlu0 %94  ;;  %vm236_vm13 = vcmp.lt.s32.totalorder %v1197_v36, 0 }
  0x92   :  { %v238_v44 = vshrl.u32 %v237_v40, 23  ;;  %v241_v45 = vand.u32 8388607, %v234_v39  ;;  %v1207_v46 = vadd.f32 %v100_v43, %v69_v38  ;;  %v134_v47 = vshrl.u32 %v133_v42, 23 }
  0x93   :  { %v137_v48 = vand.u32 8388607, %v130_v41  ;;  %v1213_v1 = vadd.f32 %v95_v58, %v68_v59  ;;  %vm1318_vm14 = vcmp.le.f32.partialorder %v234_v39, 0.7853982 }
  0x94   :  { %v990_v49 = vadd.s32 4294967169, %v238_v44  ;;  %v986_v50 = vadd.s32 4294967169, %v134_v47  ;;  %v445_v51 = vand.u32 2139095040, %v1207_v46  ;;  %v242_v52 = vor.u32 8388608, %v241_v45 }
  0x95   :  { %v138_v54 = vor.u32 8388608, %v137_v48  ;;  %v442_v56 = vand.u32 2147483647, %v1207_v46 }
  0x96   :  { %v244_v53 = vadd.s32 1, %v990_v49  ;;  %v140_v55 = vadd.s32 1, %v986_v50  ;;  %v446_v57 = vshrl.u32 %v445_v51, 23  ;;  %v1215_v2 = vshll.u32 %v242_v52, 8 }
  0x97   :  { %v1219_v4 = vshll.u32 %v138_v54, 8  ;;  %v1223_v5 = vand.u32 8388607, %v442_v56 }
  0x98   :  { %vm245_vm0 = vcmp.gt.s32.totalorder %v244_v53, 0  ;;  %vm141_vm1 = vcmp.gt.s32.totalorder %v140_v55, 0  ;;  %v998_v61 = vadd.s32 4294967169, %v446_v57 }
  0x99   :  { %v246_v60 = vsel %vm245_vm0, %v244_v53, 0  ;;  %v142_v0 = vsel %vm141_vm1, %v140_v55, 0 }
  0x9a   :  { %v247_v62 = vshrl.u32 %v246_v60, 5  ;;  %v248_v63 = vand.u32 31, %v246_v60  ;;  %v1217_v3 = vshrl.u32 %v142_v0, 5  ;;  %v144_v9 = vand.u32 31, %v142_v0 }
  0x9b   :  { %v1226_v10 = vadd.s32 1, %v998_v61 }
  0x9c   :  { %v249_v6 = vsub.s32 32, %v248_v63  ;;  %v251_v8 = vshll.u32 %v1117_v7, %v248_v63  ;;  %v254_v12 = vshll.u32 %v1118_v11, %v248_v63  ;;  %v257_v14 = vshll.u32 %v1119_v13, %v248_v63 }
  0x9d   :  { %v260_v16 = vshll.u32 %v1120_v15, %v248_v63  ;;  %v263_v18 = vshll.u32 %v1121_v17, %v248_v63  ;;  %vm266_vm2 = vcmp.lt.s32.totalorder %v247_v62, 1  ;;  %vm267_vm3 = vcmp.lt.s32.totalorder %v247_v62, 2 }
  0x9e   :  { %v252_v19 = vshrl.u32 %v1118_v11, %v249_v6  ;;  %v255_v20 = vshrl.u32 %v1119_v13, %v249_v6  ;;  %v258_v21 = vshrl.u32 %v1120_v15, %v249_v6  ;;  %v250_v22 = vshrl.u32 %v1117_v7, %v249_v6 }
  0x9f   :  { %v261_v23 = vshrl.u32 %v1121_v17, %v249_v6  ;;  %v264_v25 = vshrl.u32 %v1122_v24, %v249_v6  ;;  %v145_v33 = vsub.s32 32, %v144_v9  ;;  %vm268_vm4 = vcmp.lt.s32.totalorder %v247_v62, 3 }
  0xa0   :  { %v253_v28 = vor.u32 %v252_v19, %v251_v8  ;;  %v256_v29 = vor.u32 %v255_v20, %v254_v12  ;;  %v259_v32 = vor.u32 %v258_v21, %v257_v14  ;;  %vm269_vm5 = vcmp.lt.s32.totalorder %v247_v62, 4 }
  0xa1   :  { %v262_v34 = vor.u32 %v261_v23, %v260_v16  ;;  %v265_v35 = vor.u32 %v264_v25, %v263_v18  ;;  %v147_v48 = vshll.u32 %v1117_v7, %v144_v9  ;;  %v148_v51 = vshrl.u32 %v1118_v11, %v145_v33 }
  0xa2   :  { %v270_v38 = vsel %vm266_vm2, %v250_v22, %v253_v28  ;;  %v271_v40 = vsel %vm269_vm5, %v259_v32, 2102212464  ;;  %v274_v42 = vsel %vm266_vm2, %v253_v28, %v256_v29  ;;  %v278_v43 = vsel %vm266_vm2, %v256_v29, %v259_v32 }
  0xa3   :  { %v272_v44 = vsel %vm268_vm4, %v256_v29, %v271_v40  ;;  %v275_v45 = vsel %vm269_vm5, %v262_v34, 920167782  ;;  %v279_v47 = vsel %vm269_vm5, %v265_v35, 1326507024  ;;  %v150_v52 = vshll.u32 %v1118_v11, %v144_v9 }
  0xa4   :  { %v276_v49 = vsel %vm268_vm4, %v259_v32, %v275_v45  ;;  %v280_v50 = vsel %vm268_vm4, %v262_v34, %v279_v47  ;;  %v273_v53 = vsel %vm267_vm3, %v270_v38, %v272_v44  ;;  %v151_v57 = vshrl.u32 %v1119_v13, %v145_v33 }
  0xa5   :  { %v277_v54 = vsel %vm267_vm3, %v274_v42, %v276_v49  ;;  %v281_v55 = vsel %vm267_vm3, %v278_v43, %v280_v50  ;;  %v149_v63 = vor.u32 %v148_v51, %v147_v48  ;;  %v153_v6 = vshll.u32 %v1119_v13, %v144_v9 }
  0xa6   :  { %v1249_v58 = vmul.u32.u64.low %v1215_v2, %v281_v55  ;;  %v1250_v59 = vmul.u32.u64.high %v1215_v2, %v281_v55, %v1249_v58  ;;  %v1253_v60 = vmul.u32.u64.low %v1215_v2, %v277_v54  ;;  %v1254_v61 = vmul.u32.u64.high %v1215_v2, %v277_v54, %v1253_v60 }
  0xa7   :  { %v152_v0 = vor.u32 %v151_v57, %v150_v52  ;;  %v154_v8 = vshrl.u32 %v1120_v15, %v145_v33  ;;  %v146_v12 = vshrl.u32 %v1117_v7, %v145_v33  ;;  %v156_v62 = vshll.u32 %v1120_v15, %v144_v9 }
  0xa8   :  { %v157_v14 = vshrl.u32 %v1121_v17, %v145_v33  ;;  %v160_v16 = vshrl.u32 %v1122_v24, %v145_v33  ;;  %v289_v18 = vmul.u32 %v1215_v2, %v273_v53  ;;  %v159_v20 = vshll.u32 %v1121_v17, %v144_v9 }
  0xa9   :  { %v155_v19 = vor.u32 %v154_v8, %v153_v6  ;;  %vm162_vm6 = vcmp.lt.s32.totalorder %v1217_v3, 1  ;;  %vm291_vm7 = vc.u32 %v1250_v59, %v1253_v60  ;;  %v292_v21 = vadd.s32 1, %v1254_v61 }
  0xaa   :  { %v158_v22 = vor.u32 %v157_v14, %v156_v62  ;;  %vm163_vm8 = vcmp.lt.s32.totalorder %v1217_v3, 2  ;;  %v161_v23 = vor.u32 %v160_v16, %v159_v20  ;;  %vm164_vm9 = vcmp.lt.s32.totalorder %v1217_v3, 3 }
  0xab   :  { %vm165_vm10 = vcmp.lt.s32.totalorder %v1217_v3, 4  ;;  %v170_v25 = vsel %vm162_vm6, %v149_v63, %v152_v0  ;;  %v293_v2 = vsel %vm291_vm7, %v292_v21, %v1254_v61  ;;  %v174_v9 = vsel %vm162_vm6, %v152_v0, %v155_v19 }
  0xac   :  { %v167_v28 = vsel %vm165_vm10, %v155_v19, 2102212464  ;;  %v171_v29 = vsel %vm165_vm10, %v158_v22, 920167782  ;;  %v294_v32 = vadd.s32 %v293_v2, %v289_v18  ;;  %v166_v33 = vsel %vm162_vm6, %v146_v12, %v149_v63 }
  0xad   :  { %v172_v34 = vsel %vm164_vm9, %v155_v19, %v171_v29  ;;  %v175_v35 = vsel %vm165_vm10, %v161_v23, 1326507024  ;;  %v168_v38 = vsel %vm164_vm9, %v152_v0, %v167_v28  ;;  %vm453_vm11 = vcmp.gt.s32.totalorder %v1226_v10, 0 }
  0xae   :  { %v173_v40 = vsel %vm163_vm8, %v170_v25, %v172_v34  ;;  %v176_v42 = vsel %vm164_vm9, %v158_v22, %v175_v35  ;;  %v295_v43 = vadd.s32 536870912, %v294_v32  ;;  %v454_v50 = vsel %vm453_vm11, %v1226_v10, 0 }
  0xaf   :  { %v177_v44 = vsel %vm163_vm8, %v174_v9, %v176_v42  ;;  %v1277_v45 = vmul.u32.u64.low %v1219_v4, %v173_v40  ;;  %v1278_v47 = vmul.u32.u64.high %v1219_v4, %v173_v40, %v1277_v45  ;;  %v169_v52 = vsel %vm163_vm8, %v166_v33, %v168_v38 }
  0xb0   :  { %v1282_v48 = vmul.u32.u64.low %v1219_v4, %v177_v44  ;;  %v1283_v49 = vmul.u32.u64.high %v1219_v4, %v177_v44, %v1282_v48  ;;  %v296_v51 = vshrl.u32 %v295_v43, 30  ;;  %v456_v53 = vand.u32 31, %v454_v50 }
  0xb1   :  { %v341_v54 = vand.u32 2139095040, %v1213_v1  ;;  %v188_v57 = vadd.s32 1, %v1278_v47  ;;  %v450_v58 = vor.u32 8388608, %v1223_v5  ;;  %v185_v61 = vmul.u32 %v1219_v4, %v169_v52 }
  0xb2   :  { %v297_v55 = vshll.u32 %v296_v51, 30  ;;  %vm187_vm12 = vc.u32 %v1283_v49, %v1277_v45  ;;  %v457_v63 = vsub.s32 32, %v456_v53  ;;  %v290_v8 = vadd.s32 %v1253_v60, %v1250_v59 }
  0xb3   :  { %v189_v10 = vsel %vm187_vm12, %v188_v57, %v1278_v47  ;;  %v342_v3 = vshrl.u32 %v341_v54, 23  ;;  %v1300_v62 = vshll.u32 %v450_v58, 8  ;;  %v338_v4 = vand.u32 2147483647, %v1213_v1 }
  0xb4   :  { %v1294_v0 = vsub.s32 %v294_v32, %v297_v55  ;;  %v190_v6 = vadd.s32 %v189_v10, %v185_v61  ;;  %v1303_v14 = vshrl.u32 %v454_v50, 5  ;;  %v460_v16 = vshrl.u32 %v1118_v11, %v457_v63 }
  0xb5   :  { %v463_v18 = vshrl.u32 %v1119_v13, %v457_v63  ;;  %v466_v20 = vshrl.u32 %v1120_v15, %v457_v63  ;;  %v469_v21 = vshrl.u32 %v1121_v17, %v457_v63  ;;  %v1310_v59 = vadd.s32 4294967169, %v342_v3 }
  0xb6   :  { %v300_v12 = vsub.s32 0, %v1294_v0  ;;  %v191_v5 = vadd.s32 536870912, %v190_v6  ;;  %v320_v60 = vsub.s32 4, %v296_v51  ;;  %v459_v23 = vshll.u32 %v1117_v7, %v456_v53 }
  0xb7   :  { %v462_v25 = vshll.u32 %v1118_v11, %v456_v53  ;;  %v465_v29 = vshll.u32 %v1119_v13, %v456_v53  ;;  %v468_v9 = vshll.u32 %v1120_v15, %v456_v53  ;;  %v472_v32 = vshrl.u32 %v1122_v24, %v457_v63 }
  0xb8   :  { %v991_v19 = vmin.u32 %v300_v12, %v1294_v0  ;;  %v1312_v22 = vshrl.u32 %v191_v5, 30  ;;  %v461_v34 = vor.u32 %v460_v16, %v459_v23  ;;  %v1328_v38 = vand.u32 8388607, %v338_v4 }
  0xb9   :  { %v464_v35 = vor.u32 %v463_v18, %v462_v25  ;;  %v467_v39 = vor.u32 %v466_v20, %v465_v29  ;;  %v470_v42 = vor.u32 %v469_v21, %v468_v9  ;;  %v471_v43 = vshll.u32 %v1121_v17, %v456_v53 }
  0xba   :  { %v302_v28 = vclz %v991_v19  ;;  %v193_v33 = vshll.u32 %v1312_v22, 30  ;;  %v321_v44 = vsel %vm236_vm13, %v320_v60, %v296_v51  ;;  %v458_v48 = vshrl.u32 %v1117_v7, %v457_v63 }
  0xbb   :  { %vm474_vm15 = vcmp.lt.s32.totalorder %v1303_v14, 1  ;;  %v473_v50 = vor.u32 %v472_v32, %v471_v43  ;;  %vm475_vm1 = vcmp.lt.s32.totalorder %v1303_v14, 2  ;;  %vm476_vm2 = vcmp.lt.s32.totalorder %v1303_v14, 3 }
  0xbc   :  { %v992_v40 = vadd.s32 4294967294, %v302_v28  ;;  %v1333_v47 = vsub.s32 %v190_v6, %v193_v33  ;;  %vm132_vm3 = vcmp.lt.s32.totalorder %v1199_v37, 0  ;;  %vm477_vm4 = vcmp.lt.s32.totalorder %v1303_v14, 4 }
  0xbd   :  { %v482_v51 = vsel %vm474_vm15, %v461_v34, %v464_v35  ;;  %v479_v57 = vsel %vm477_vm4, %v467_v39, 2102212464  ;;  %v483_v58 = vsel %vm477_vm4, %v470_v42, 920167782  ;;  %v486_v3 = vsel %vm474_vm15, %v464_v35, %v467_v39 }
  0xbe   :  { %vm993_vm0 = vcmp.lt.s32.totalorder %v992_v40, 0  ;;  %v196_v53 = vsub.s32 0, %v1333_v47  ;;  %v484_v10 = vsel %vm476_vm2, %v467_v39, %v483_v58  ;;  %v487_v16 = vsel %vm477_vm4, %v473_v50, 1326507024  ;;  %v110_v58 = vpop.permute.xlu1 %109 }
  0xbf   :  { %v305_v52 = vsel %vm993_vm0, 0, %v992_v40  ;;  %v485_v5 = vsel %vm475_vm1, %v482_v51, %v484_v10  ;;  %v323_v18 = vsel %vm1318_vm14, 0, %v321_v44  ;;  %vm1356_vm5 = vcmp.le.f32.partialorder %v130_v41, 0.7853982 }
  0xc0   :  { %v306_v54 = vsub.s32 32, %v305_v52  ;;  %v310_v55 = vsub.s32 4294967266, %v305_v52  ;;  %v307_v61 = vshll.u32 %v1294_v0, %v305_v52  ;;  %v987_v63 = vmin.u32 %v196_v53, %v1333_v47 }
  0xc1   :  { %v478_v20 = vsel %vm474_vm15, %v458_v48, %v461_v34  ;;  %v216_v23 = vsub.s32 4, %v1312_v22  ;;  %v488_v25 = vsel %vm476_vm2, %v470_v42, %v487_v16  ;;  %v327_v40 = vadd.s32 3, %v323_v18 }
  0xc2   :  { %v308_v6 = vshrl.u32 %v290_v8, %v306_v54  ;;  %v311_v12 = vadd.s32 127, %v310_v55  ;;  %v198_v19 = vclz %v987_v63  ;;  %v480_v8 = vsel %vm476_vm2, %v464_v35, %v479_v57 }
  0xc3   :  { %v489_v41 = vsel %vm475_vm1, %v486_v3, %v488_v25  ;;  %v1370_v29 = vmul.u32.u64.low %v1300_v62, %v485_v5  ;;  %v1371_v9 = vmul.u32.u64.high %v1300_v62, %v485_v5, %v1370_v29  ;;  %v481_v33 = vsel %vm475_vm1, %v478_v20, %v480_v8 }
  0xc4   :  { %v309_v21 = vor.u32 %v308_v6, %v307_v61  ;;  %v312_v60 = vshll.u32 %v311_v12, 23  ;;  %v988_v28 = vadd.s32 4294967294, %v198_v19  ;;  %v186_v39 = vadd.s32 %v1277_v45, %v1283_v49 }
  0xc5   :  { %v1377_v34 = vmul.u32.u64.low %v1300_v62, %v489_v41  ;;  %v1378_v35 = vmul.u32.u64.high %v1300_v62, %v489_v41, %v1377_v34  ;;  %v348_v42 = vadd.s32 1, %v1310_v59  ;;  %v217_v50 = vsel %vm132_vm3, %v216_v23, %v1312_v22 }
  0xc6   :  { %v313_v32 = vor.u32 4788187, %v312_v60  ;;  %vm989_vm6 = vcmp.lt.s32.totalorder %v988_v28, 0  ;;  %v316_v44 = vcvt.s32.f32 %v309_v21  ;;  %v497_v53 = vmul.u32 %v1300_v62, %v481_v33 }
  0xc7   :  { %v201_v48 = vsel %vm989_vm6, 0, %v988_v28  ;;  %v500_v51 = vadd.s32 1, %v1371_v9  ;;  %vm499_vm7 = vc.u32 %v1378_v35, %v1370_v29  ;;  %vm349_vm8 = vcmp.gt.s32.totalorder %v348_v42, 0 }
  0xc8   :  { %v314_v43 = vand.u32 2147483647, %v313_v32  ;;  %v202_v14 = vsub.s32 32, %v201_v48  ;;  %v206_v52 = vsub.s32 4294967266, %v201_v48  ;;  %v203_v55 = vshll.u32 %v1333_v47, %v201_v48 }
  0xc9   :  { %v501_v59 = vsel %vm499_vm7, %v500_v51, %v1371_v9  ;;  %v350_v57 = vsel %vm349_vm8, %v348_v42, 0  ;;  %v219_v61 = vsel %vm1356_vm5, 0, %v217_v50  ;;  %v1397_v5 = vadd.f32 %v110_v58, %v1189_v26 }
  0xca   :  { %v317_v54 = vmul.f32 %v316_v44, %v314_v43  ;;  %v204_v45 = vshrl.u32 %v186_v39, %v202_v14  ;;  %v207_v49 = vadd.s32 127, %v206_v52  ;;  %v502_v62 = vadd.s32 %v501_v59, %v497_v53 }
  0xcb   :  { %v352_v63 = vand.u32 31, %v350_v57  ;;  %v1402_v18 = vand.u32 3, %v327_v40  ;;  %v1404_v20 = vadd.s32 3, %v219_v61  ;;  %v346_v21 = vor.u32 8388608, %v1328_v38 }
  0xcc   :  { %v318_v22 = vxor.u32 2147483648, %v317_v54  ;;  %v205_v10 = vor.u32 %v204_v45, %v203_v55  ;;  %v208_v3 = vshll.u32 %v207_v49, 23  ;;  %v503_v6 = vadd.s32 536870912, %v502_v62 }
  0xcd   :  { %v353_v12 = vsub.s32 32, %v352_v63  ;;  %vm444_vm9 = vcmp.lt.s32.totalorder %v1207_v46, 0  ;;  %v1410_v28 = vshrl.u32 %v350_v57, 5  ;;  %v355_v41 = vshll.u32 %v1117_v7, %v352_v63 }
  0xce   :  { %v319_v47 = vsel %vm236_vm13, %v318_v22, %v317_v54  ;;  %v209_v19 = vor.u32 4788187, %v208_v3  ;;  %v504_v8 = vshrl.u32 %v503_v6, 30  ;;  %v212_v25 = vcvt.s32.f32 %v205_v10 }
  0xcf   :  { %v322_v16 = vsel %vm1318_vm14, %v1197_v36, %v319_v47  ;;  %v356_v60 = vshrl.u32 %v1118_v11, %v353_v12  ;;  %v359_v26 = vshrl.u32 %v1119_v13, %v353_v12  ;;  %v362_v9 = vshrl.u32 %v1120_v15, %v353_v12 }
  0xd0   :  { %1062 = vcosq.f32 %v322_v16  ;;  %v210_v23 = vand.u32 2147483647, %v209_v19  ;;  %v505_v2 = vshll.u32 %v504_v8, 30  ;;  %v358_v33 = vshll.u32 %v1118_v11, %v352_v63 }
  0xd1   :  { %1064 = vsinq.f32 %v322_v16  ;;  %v364_v38 = vshll.u32 %v1120_v15, %v352_v63  ;;  %v365_v34 = vshrl.u32 %v1121_v17, %v353_v12  ;;  %v357_v39 = vor.u32 %v356_v60, %v355_v41 }
  0xd2   :  { %v213_v32 = vmul.f32 %v212_v25, %v210_v23  ;;  %v1417_v40 = vsub.s32 %v502_v62, %v505_v2  ;;  %v361_v42 = vshll.u32 %v1119_v13, %v352_v63  ;;  %v653_v43 = vand.u32 2139095040, %v1397_v5 }
  0xd3   :  { %v360_v48 = vor.u32 %v359_v26, %v358_v33  ;;  %v366_v50 = vor.u32 %v365_v34, %v364_v38  ;;  %v368_v14 = vshrl.u32 %v1122_v24, %v353_v12  ;;  %v498_v52 = vadd.s32 %v1370_v29, %v1378_v35 }
  0xd4   :  { %v214_v44 = vxor.u32 2147483648, %v213_v32  ;;  %v508_v53 = vsub.s32 0, %v1417_v40  ;;  %v363_v51 = vor.u32 %v362_v9, %v361_v42  ;;  %v367_v54 = vshll.u32 %v1121_v17, %v352_v63 }
  0xd5   :  { %vm333_vm10 = vcmp.eq.s32.totalorder %v1402_v18, 2  ;;  %v528_v45 = vsub.s32 4, %v504_v8  ;;  %vm370_vm11 = vcmp.lt.s32.totalorder %v1410_v28, 1  ;;  %v386_v49 = vshll.u32 %v346_v21, 8 }
  0xd6   :  { %v215_v55 = vsel %vm132_vm3, %v214_v44, %v213_v32  ;;  %vm330_vm12 = vcmp.eq.s32.totalorder %v1402_v18, 0  ;;  %v999_v35 = vmin.u32 %v508_v53, %v1417_v40  ;;  %v369_v59 = vor.u32 %v368_v14, %v367_v54 }
  0xd7   :  { %v218_v29 = vsel %vm1356_vm5, %v1199_v37, %v215_v55  ;;  %vm373_vm13 = vcmp.lt.s32.totalorder %v1410_v28, 4  ;;  %vm329_vm14 = vcmp.lt.s32.totalorder %v1402_v18, 2  ;;  %v354_v57 = vshrl.u32 %v1117_v7, %v353_v12 }
  0xd8   :  { %1066 = vcosq.f32 %v218_v29  ;;  %v378_v58 = vsel %vm370_vm11, %v357_v39, %v360_v48  ;;  %v379_v22 = vsel %vm373_vm13, %v366_v50, 920167782  ;;  %vm326_vm15 = vweird.f32 %v1197_v36 }
  0xd9   :  { %1068 = vsinq.f32 %v218_v29  ;;  %vm1445_vm0 = vcmp.le.f32.partialorder %v442_v56, 0.7853982  ;;  %v510_v61 = vclz %v999_v35  ;;  %vm372_vm1 = vcmp.lt.s32.totalorder %v1410_v28, 3 }
  0xda   :  { %v375_v62 = vsel %vm373_vm13, %v363_v51, 2102212464  ;;  %v529_v63 = vsel %vm444_vm9, %v528_v45, %v504_v8  ;;  %vm371_vm2 = vcmp.lt.s32.totalorder %v1410_v28, 2  ;;  %v380_v10 = vsel %vm372_vm1, %v363_v51, %v379_v22 }
  0xdb   :  { %v382_v3 = vsel %vm370_vm11, %v360_v48, %v363_v51  ;;  %v1000_v47 = vadd.s32 4294967294, %v510_v61  ;;  %v374_v56 = vsel %vm370_vm11, %v354_v57, %v357_v39  ;;  %v381_v6 = vsel %vm371_vm2, %v378_v58, %v380_v10 }
  0xdc   :  { %v383_v12 = vsel %vm373_vm13, %v369_v59, 1326507024  ;;  %v376_v19 = vsel %vm372_vm1, %v360_v48, %v375_v62  ;;  %v1463_v8 = vmul.u32.u64.low %v386_v49, %v381_v6  ;;  %v1464_v60 = vmul.u32.u64.high %v386_v49, %v381_v6, %v1463_v8 }
  0xdd   :  { %v1063_v16 = vpop.eup %1062  ;;  %v384_v21 = vsel %vm372_vm1, %v366_v50, %v383_v12  ;;  %vm1001_vm3 = vcmp.lt.s32.totalorder %v1000_v47, 0  ;;  %v654_v2 = vshrl.u32 %v653_v43, 23  ;;  %v377_v42 = vsel %vm371_vm2, %v374_v56, %v376_v19 }
  0xde   :  { %v1065_v23 = vpop.eup %1064  ;;  %v334_v25 = vxor.u32 2147483648, %v1063_v16  ;;  %v385_v26 = vsel %vm371_vm2, %v382_v3, %v384_v21  ;;  %v513_v9 = vsel %vm1001_vm3, 0, %v1000_v47  ;;  %v224_v48 = vand.u32 3, %v1404_v20  ;;  %v105_v20 = vpop.permute.xlu0 %104 }
  0xdf   :  { %v331_v41 = vxor.u32 2147483648, %v1065_v23  ;;  %v1469_v32 = vmul.u32.u64.low %v386_v49, %v385_v26  ;;  %v1470_v33 = vmul.u32.u64.high %v386_v49, %v385_v26, %v1469_v32  ;;  %v514_v34 = vsub.s32 32, %v513_v9 }
  0xe0   :  { %v335_v38 = vsel %vm333_vm10, %v334_v25, %v1065_v23  ;;  %v518_v39 = vsub.s32 4294967266, %v513_v9  ;;  %v396_v43 = vadd.s32 1, %v1464_v60  ;;  %v1006_v50 = vadd.s32 4294967169, %v654_v2 }
  0xe1   :  { %v332_v44 = vsel %vm330_vm12, %v1063_v16, %v331_v41  ;;  %v515_v53 = vshll.u32 %v1417_v40, %v513_v9  ;;  %v516_v51 = vshrl.u32 %v498_v52, %v514_v34  ;;  %v531_v28 = vsel %vm1445_vm0, 0, %v529_v63 }
  0xe2   :  { %v336_v14 = vsel %vm329_vm14, %v332_v44, %v335_v38  ;;  %v519_v54 = vadd.s32 127, %v518_v39  ;;  %v393_v45 = vmul.u32 %v386_v49, %v377_v42  ;;  %vm395_vm4 = vc.u32 %v1470_v33, %v1463_v8 }
  0xe3   :  { %v337_v55 = vsel %vm326_vm15, nan, %v336_v14  ;;  %v517_v29 = vor.u32 %v516_v51, %v515_v53  ;;  %v397_v18 = vsel %vm395_vm4, %v396_v43, %v1464_v60  ;;  %v660_v59 = vadd.s32 1, %v1006_v50 }
  0xe4   :  { %963 = vst [vmem:[#allocation2 + $0x8] sm:$0xff] %v337_v55  ;;  %v520_v35 = vshll.u32 %v519_v54, 23  ;;  %v398_v40 = vadd.s32 %v397_v18, %v393_v45  ;;  %v650_v52 = vand.u32 2147483647, %v1397_v5  ;;  %vm229_vm5 = vcmp.eq.s32.totalorder %v224_v48, 2 }
  0xe5   :  { %v1067_v57 = vpop.eup %1066  ;;  %vm661_vm6 = vcmp.gt.s32.totalorder %v660_v59, 0  ;;  %v1492_v58 = vadd.f32 %v105_v20, %v1191_v27  ;;  %v535_v61 = vadd.s32 3, %v531_v28  ;;  %v524_v47 = vcvt.s32.f32 %v517_v29 }
  0xe6   :  { %v521_v36 = vor.u32 4788187, %v520_v35  ;;  %v1069_v49 = vpop.eup %1068  ;;  %v230_v22 = vxor.u32 2147483648, %v1067_v57  ;;  %v399_v62 = vadd.s32 536870912, %v398_v40  ;;  %v662_v63 = vsel %vm661_vm6, %v660_v59, 0 }
  0xe7   :  { %v227_v10 = vxor.u32 2147483648, %v1069_v49  ;;  %v664_v56 = vand.u32 31, %v662_v63  ;;  %vm226_vm7 = vcmp.eq.s32.totalorder %v224_v48, 0  ;;  %v657_v16 = vand.u32 8388607, %v650_v52 }
  0xe8   :  { %v522_v3 = vand.u32 2147483647, %v521_v36  ;;  %v231_v6 = vsel %vm229_vm5, %v230_v22, %v1069_v49  ;;  %v1494_v12 = vshrl.u32 %v399_v62, 30  ;;  %vm225_vm8 = vcmp.lt.s32.totalorder %v224_v48, 2 }
  0xe9   :  { %v228_v19 = vsel %vm226_vm7, %v1067_v57, %v227_v10  ;;  %v665_v21 = vsub.s32 32, %v664_v56  ;;  %vm222_vm10 = vweird.f32 %v1199_v37  ;;  %v1500_v2 = vand.u32 3, %v535_v61 }
  0xea   :  { %v525_v27 = vmul.f32 %v524_v47, %v522_v3  ;;  %v232_v60 = vsel %vm225_vm8, %v228_v19, %v231_v6  ;;  %v401_v23 = vshll.u32 %v1494_v12, 30  ;;  %v658_v32 = vor.u32 8388608, %v657_v16 }
  0xeb   :  { %v233_v25 = vsel %vm222_vm10, nan, %v232_v60  ;;  %v668_v41 = vshrl.u32 %v1118_v11, %v665_v21  ;;  %v671_v38 = vshrl.u32 %v1119_v13, %v665_v21  ;;  %v549_v34 = vand.u32 2139095040, %v1492_v58 }
  0xec   :  { %v526_v26 = vxor.u32 2147483648, %v525_v27  ;;  %962 = vst [vmem:[#allocation2] sm:$0xff] %v233_v25  ;;  %v1503_v9 = vsub.s32 %v398_v40, %v401_v23  ;;  %v663_v39 = vshrl.u32 %v662_v63, 5  ;;  %v667_v42 = vshll.u32 %v1117_v7, %v664_v56 }
  0xed   :  { %v674_v44 = vshrl.u32 %v1120_v15, %v665_v21  ;;  %v670_v50 = vshll.u32 %v1118_v11, %v664_v56  ;;  %v673_v14 = vshll.u32 %v1119_v13, %v664_v56  ;;  %v676_v51 = vshll.u32 %v1120_v15, %v664_v56 }
  0xee   :  { %v527_v37 = vsel %vm444_vm9, %v526_v26, %v525_v27  ;;  %v404_v43 = vsub.s32 0, %v1503_v9  ;;  %v669_v53 = vor.u32 %v668_v41, %v667_v42  ;;  %v677_v54 = vshrl.u32 %v1121_v17, %v665_v21 }
  0xef   :  { %v530_v48 = vsel %vm1445_vm0, %v1207_v46, %v527_v37  ;;  %v672_v28 = vor.u32 %v671_v38, %v670_v50  ;;  %v675_v45 = vor.u32 %v674_v44, %v673_v14  ;;  %v679_v0 = vshll.u32 %v1121_v17, %v664_v56 }
  0xf0   :  { %1070 = vcosq.f32 %v530_v48  ;;  %v995_v55 = vmin.u32 %v404_v43, %v1503_v9  ;;  %v678_v20 = vor.u32 %v677_v54, %v676_v51  ;;  %v680_v29 = vshrl.u32 %v1122_v24, %v665_v21 }
  0xf1   :  { %1072 = vsinq.f32 %v530_v48  ;;  %v698_v35 = vshll.u32 %v658_v32, 8  ;;  %v666_v59 = vshrl.u32 %v1117_v7, %v665_v21  ;;  %vm682_vm9 = vcmp.lt.s32.totalorder %v663_v39, 1 }
  0xf2   :  { %v406_v18 = vclz %v995_v55  ;;  %v550_v40 = vshrl.u32 %v549_v34, 23  ;;  %v681_v57 = vor.u32 %v680_v29, %v679_v0  ;;  %vm683_vm11 = vcmp.lt.s32.totalorder %v663_v39, 2 }
  0xf3   :  { %vm684_vm12 = vcmp.lt.s32.totalorder %v663_v39, 3  ;;  %vm685_vm13 = vcmp.lt.s32.totalorder %v663_v39, 4  ;;  %v690_v22 = vsel %vm682_vm9, %v669_v53, %v672_v28  ;;  %v686_v62 = vsel %vm682_vm9, %v666_v59, %v669_v53 }
  0xf4   :  { %v996_v36 = vadd.s32 4294967294, %v406_v18  ;;  %v687_v49 = vsel %vm685_vm13, %v675_v45, 2102212464  ;;  %v691_v61 = vsel %vm685_vm13, %v678_v20, 920167782  ;;  %v694_v10 = vsel %vm682_vm9, %v672_v28, %v675_v45 }
  0xf5   :  { %v692_v63 = vsel %vm684_vm12, %v675_v45, %v691_v61  ;;  %v695_v3 = vsel %vm685_vm13, %v681_v57, 1326507024  ;;  %v688_v47 = vsel %vm684_vm12, %v672_v28, %v687_v49  ;;  %vm340_vm15 = vcmp.lt.s32.totalorder %v1213_v1, 0  ;;  %v120_v57 = vpop.permute.xlu1 %119 }
  0xf6   :  { %vm997_vm14 = vcmp.lt.s32.totalorder %v996_v36, 0  ;;  %v693_v56 = vsel %vm683_vm11, %v690_v22, %v692_v63  ;;  %v696_v6 = vsel %vm684_vm12, %v678_v20, %v695_v3  ;;  %v394_v60 = vadd.s32 %v1463_v8, %v1470_v33 }
  0xf7   :  { %v409_v16 = vsel %vm997_vm14, 0, %v996_v36  ;;  %v697_v19 = vsel %vm683_vm11, %v694_v10, %v696_v6  ;;  %v1525_v27 = vmul.u32.u64.low %v698_v35, %v693_v56  ;;  %v1526_v21 = vmul.u32.u64.high %v698_v35, %v693_v56, %v1525_v27 }
  0xf8   :  { %v410_v23 = vsub.s32 32, %v409_v16  ;;  %v414_v25 = vsub.s32 4294967266, %v409_v16  ;;  %v1532_v26 = vmul.u32.u64.low %v698_v35, %v697_v19  ;;  %v1533_v41 = vmul.u32.u64.high %v698_v35, %v697_v19, %v1532_v26 }
  0xf9   :  { %v546_v32 = vand.u32 2147483647, %v1492_v58  ;;  %v1002_v38 = vadd.s32 4294967169, %v550_v40  ;;  %v411_v34 = vshll.u32 %v1503_v9, %v409_v16  ;;  %v689_v44 = vsel %vm683_vm11, %v686_v62, %v688_v47 }
  0xfa   :  { %v412_v37 = vshrl.u32 %v394_v60, %v410_v23  ;;  %v415_v42 = vadd.s32 127, %v414_v25  ;;  %vm537_vm0 = vcmp.lt.s32.totalorder %v1500_v2, 2  ;;  %v424_v48 = vsub.s32 4, %v1494_v12 }
  0xfb   :  { %v708_v8 = vadd.s32 1, %v1526_v21  ;;  %v556_v33 = vadd.s32 1, %v1002_v38  ;;  %vm538_vm1 = vcmp.eq.s32.totalorder %v1500_v2, 0  ;;  %vm541_vm2 = vcmp.eq.s32.totalorder %v1500_v2, 2 }
  0xfc   :  { %v413_v50 = vor.u32 %v412_v37, %v411_v34  ;;  %v416_v14 = vshll.u32 %v415_v42, 23  ;;  %v705_v51 = vmul.u32 %v698_v35, %v689_v44  ;;  %vm707_vm3 = vc.u32 %v1533_v41, %v1525_v27 }
  0xfd   :  { %v1071_v43 = vpop.eup %1070  ;;  %vm557_vm4 = vcmp.gt.s32.totalorder %v556_v33, 0  ;;  %v709_v55 = vsel %vm707_vm3, %v708_v8, %v1526_v21  ;;  %v553_v28 = vand.u32 8388607, %v546_v32  ;;  %v425_v20 = vsel %vm340_vm15, %v424_v48, %v1494_v12 }
  0xfe   :  { %v1073_v53 = vpop.eup %1072  ;;  %v542_v9 = vxor.u32 2147483648, %v1071_v43  ;;  %v417_v54 = vor.u32 4788187, %v416_v14  ;;  %v710_v0 = vadd.s32 %v709_v55, %v705_v51  ;;  %v558_v29 = vsel %vm557_vm4, %v556_v33, 0 }
  0xff   :  { %v539_v39 = vxor.u32 2147483648, %v1073_v53  ;;  %v420_v59 = vcvt.s32.f32 %v413_v50  ;;  %v560_v40 = vand.u32 31, %v558_v29  ;;  %vm534_vm5 = vweird.f32 %v1207_v46 }
 0x100   :  { %v543_v45 = vsel %vm541_vm2, %v542_v9, %v1073_v53  ;;  %v418_v18 = vand.u32 2147483647, %v417_v54  ;;  %vm1558_vm6 = vcmp.le.f32.partialorder %v338_v4, 0.7853982  ;;  %v711_v12 = vadd.s32 536870912, %v710_v0 }
 0x101   :  { %v540_v35 = vsel %vm538_vm1, %v1071_v43, %v539_v39  ;;  %v427_v62 = vsel %vm1558_vm6, 0, %v425_v20  ;;  %v561_v63 = vsub.s32 32, %v560_v40  ;;  %v554_v46 = vor.u32 8388608, %v553_v28 }
 0x102   :  { %v544_v36 = vsel %vm537_vm0, %v540_v35, %v543_v45  ;;  %v421_v61 = vmul.f32 %v420_v59, %v418_v18  ;;  %v1564_v10 = vshrl.u32 %v711_v12, 30  ;;  %v563_v2 = vshll.u32 %v1117_v7, %v560_v40 }
 0x103   :  { %v545_v22 = vsel %vm534_vm5, nan, %v544_v36  ;;  %v1568_v3 = vadd.f32 %v120_v57, %v1193_v30  ;;  %v564_v47 = vshrl.u32 %v1118_v11, %v561_v63  ;;  %v566_v56 = vshll.u32 %v1118_v11, %v560_v40 }
 0x104   :  { %965 = vst [vmem:[#allocation2 + $0x18] sm:$0xff] %v545_v22  ;;  %v422_v4 = vxor.u32 2147483648, %v421_v61  ;;  %v567_v6 = vshrl.u32 %v1119_v13, %v561_v63  ;;  %v713_v16 = vshll.u32 %v1564_v10, 30  ;;  %v569_v19 = vshll.u32 %v1119_v13, %v560_v40 }
 0x105   :  { %v570_v21 = vshrl.u32 %v1120_v15, %v561_v63  ;;  %v573_v60 = vshrl.u32 %v1121_v17, %v561_v63  ;;  %v559_v30 = vshrl.u32 %v558_v29, 5  ;;  %v565_v25 = vor.u32 %v564_v47, %v563_v2 }
 0x106   :  { %v423_v23 = vsel %vm340_vm15, %v422_v4, %v421_v61  ;;  %v572_v26 = vshll.u32 %v1120_v15, %v560_v40  ;;  %v1583_v34 = vsub.s32 %v710_v0, %v713_v16  ;;  %v568_v37 = vor.u32 %v567_v6, %v566_v56 }
 0x107   :  { %v426_v38 = vsel %vm1558_vm6, %v1213_v1, %v423_v23  ;;  %v571_v42 = vor.u32 %v570_v21, %v569_v19  ;;  %v575_v48 = vshll.u32 %v1121_v17, %v560_v40  ;;  %v576_v8 = vshrl.u32 %v1122_v24, %v561_v63 }
 0x108   :  { %1074 = vcosq.f32 %v426_v38  ;;  %v574_v44 = vor.u32 %v573_v60, %v572_v26  ;;  %v716_v33 = vsub.s32 0, %v1583_v34  ;;  %v431_v43 = vadd.s32 3, %v427_v62  ;;  %v115_v26 = vpop.permute.xlu0 %114 }
 0x109   :  { %1076 = vsinq.f32 %v426_v38  ;;  %v577_v50 = vor.u32 %v576_v8, %v575_v48  ;;  %vm581_vm7 = vcmp.lt.s32.totalorder %v559_v30, 4  ;;  %v861_v14 = vand.u32 2139095040, %v1568_v3 }
 0x10a   :  { %v1007_v53 = vmin.u32 %v716_v33, %v1583_v34  ;;  %v562_v9 = vshrl.u32 %v1117_v7, %v561_v63  ;;  %vm578_vm8 = vcmp.lt.s32.totalorder %v559_v30, 1  ;;  %v583_v51 = vsel %vm581_vm7, %v571_v42, 2102212464 }
 0x10b   :  { %vm579_vm10 = vcmp.lt.s32.totalorder %v559_v30, 2  ;;  %v586_v39 = vsel %vm578_vm8, %v565_v25, %v568_v37  ;;  %v587_v54 = vsel %vm581_vm7, %v574_v44, 920167782  ;;  %v594_v55 = vshll.u32 %v554_v46, 8 }
 0x10c   :  { %v718_v28 = vclz %v1007_v53  ;;  %vm580_vm9 = vcmp.lt.s32.totalorder %v559_v30, 3  ;;  %v582_v45 = vsel %vm578_vm8, %v562_v9, %v565_v25  ;;  %v590_v20 = vsel %vm578_vm8, %v568_v37, %v571_v42 }
 0x10d   :  { %v584_v0 = vsel %vm580_vm9, %v568_v37, %v583_v51  ;;  %v588_v29 = vsel %vm580_vm9, %v571_v42, %v587_v54  ;;  %v591_v35 = vsel %vm581_vm7, %v577_v50, 1326507024  ;;  %v862_v18 = vshrl.u32 %v861_v14, 23 }
 0x10e   :  { %v432_v59 = vand.u32 3, %v431_v43  ;;  %v1008_v40 = vadd.s32 4294967294, %v718_v28  ;;  %v589_v57 = vsel %vm579_vm10, %v586_v39, %v588_v29  ;;  %v592_v36 = vsel %vm580_vm9, %v574_v44, %v591_v35 }
 0x10f   :  { %v593_v49 = vsel %vm579_vm10, %v590_v20, %v592_v36  ;;  %v1596_v12 = vmul.u32.u64.low %v594_v55, %v589_v57  ;;  %v1597_v22 = vmul.u32.u64.high %v594_v55, %v589_v57, %v1596_v12  ;;  %v1014_v61 = vadd.s32 4294967169, %v862_v18 }
 0x110   :  { %vm1009_vm11 = vcmp.lt.s32.totalorder %v1008_v40, 0  ;;  %v585_v62 = vsel %vm579_vm10, %v582_v45, %v584_v0  ;;  %v1601_v63 = vmul.u32.u64.low %v594_v55, %v593_v49  ;;  %v1602_v46 = vmul.u32.u64.high %v594_v55, %v593_v49, %v1601_v63 }
 0x111   :  { %v721_v2 = vsel %vm1009_vm11, 0, %v1008_v40  ;;  %v858_v4 = vand.u32 2147483647, %v1568_v3  ;;  %v868_v47 = vadd.s32 1, %v1014_v61  ;;  %vm430_vm12 = vweird.f32 %v1213_v1 }
 0x112   :  { %v706_v56 = vadd.s32 %v1525_v27, %v1533_v41  ;;  %v722_v6 = vsub.s32 32, %v721_v2  ;;  %v726_v16 = vsub.s32 4294967266, %v721_v2  ;;  %vm437_vm13 = vcmp.eq.s32.totalorder %v432_v59, 2 }
 0x113   :  { %v601_v19 = vmul.u32 %v594_v55, %v585_v62  ;;  %v604_v21 = vadd.s32 1, %v1597_v22  ;;  %vm869_vm14 = vcmp.gt.s32.totalorder %v868_v47, 0  ;;  %v723_v23 = vshll.u32 %v1583_v34, %v721_v2 }
 0x114   :  { %v724_v30 = vshrl.u32 %v706_v56, %v722_v6  ;;  %v727_v25 = vadd.s32 127, %v726_v16  ;;  %vm603_vm15 = vc.u32 %v1602_v46, %v1596_v12  ;;  %v865_v41 = vand.u32 8388607, %v858_v4 }
 0x115   :  { %v1075_v60 = vpop.eup %1074  ;;  %v605_v27 = vsel %vm603_vm15, %v604_v21, %v1597_v22  ;;  %v870_v42 = vsel %vm869_vm14, %v868_v47, 0  ;;  %vm434_vm0 = vcmp.eq.s32.totalorder %v432_v59, 0  ;;  %vm652_vm1 = vcmp.lt.s32.totalorder %v1397_v5, 0 }
 0x116   :  { %v1077_v38 = vpop.eup %1076  ;;  %v438_v37 = vxor.u32 2147483648, %v1075_v60  ;;  %v725_v48 = vor.u32 %v724_v30, %v723_v23  ;;  %v728_v8 = vshll.u32 %v727_v25, 23  ;;  %v606_v33 = vadd.s32 %v605_v27, %v601_v19 }
 0x117   :  { %v435_v44 = vxor.u32 2147483648, %v1077_v38  ;;  %v872_v43 = vand.u32 31, %v870_v42  ;;  %v1618_v50 = vadd.f32 %v115_v26, %v1195_v31  ;;  %vm433_vm2 = vcmp.lt.s32.totalorder %v432_v59, 2 }
 0x118   :  { %v439_v34 = vsel %vm437_vm13, %v438_v37, %v1077_v38  ;;  %vm1622_vm3 = vcmp.le.f32.partialorder %v650_v52, 0.7853982  ;;  %v729_v9 = vor.u32 4788187, %v728_v8  ;;  %v607_v51 = vadd.s32 536870912, %v606_v33 }
 0x119   :  { %v436_v14 = vsel %vm434_vm0, %v1075_v60, %v435_v44  ;;  %v736_v54 = vsub.s32 4, %v1564_v10  ;;  %v866_v55 = vor.u32 8388608, %v865_v41  ;;  %v873_v28 = vsub.s32 32, %v872_v43 }
 0x11a   :  { %v440_v39 = vsel %vm433_vm2, %v436_v14, %v439_v34  ;;  %v730_v31 = vand.u32 2147483647, %v729_v9  ;;  %v732_v20 = vcvt.s32.f32 %v725_v48  ;;  %v1629_v0 = vshrl.u32 %v607_v51, 30 }
 0x11b   :  { %v441_v45 = vsel %vm430_vm12, nan, %v440_v39  ;;  %v876_v52 = vshrl.u32 %v1118_v11, %v873_v28  ;;  %v879_v29 = vshrl.u32 %v1119_v13, %v873_v28  ;;  %v882_v35 = vshrl.u32 %v1120_v15, %v873_v28 }
 0x11c   :  { %964 = vst [vmem:[#allocation2 + $0x10] sm:$0xff] %v441_v45  ;;  %v757_v18 = vand.u32 2139095040, %v1618_v50  ;;  %v733_v59 = vmul.f32 %v732_v20, %v730_v31  ;;  %v609_v40 = vshll.u32 %v1629_v0, 30  ;;  %v875_v57 = vshll.u32 %v1117_v7, %v872_v43 }
 0x11d   :  { %v878_v1 = vshll.u32 %v1118_v11, %v872_v43  ;;  %v871_v36 = vshrl.u32 %v870_v42, 5  ;;  %v881_v49 = vshll.u32 %v1119_v13, %v872_v43  ;;  %v884_v22 = vshll.u32 %v1120_v15, %v872_v43 }
 0x11e   :  { %v885_v61 = vshrl.u32 %v1121_v17, %v873_v28  ;;  %v734_v62 = vxor.u32 2147483648, %v733_v59  ;;  %v610_v63 = vsub.s32 %v606_v33, %v609_v40  ;;  %v877_v2 = vor.u32 %v876_v52, %v875_v57 }
 0x11f   :  { %v880_v47 = vor.u32 %v879_v29, %v878_v1  ;;  %v883_v56 = vor.u32 %v882_v35, %v881_v49  ;;  %v887_v16 = vshll.u32 %v1121_v17, %v872_v43  ;;  %v888_v19 = vshrl.u32 %v1122_v24, %v873_v28 }
 0x120   :  { %v886_v6 = vor.u32 %v885_v61, %v884_v22  ;;  %v735_v21 = vsel %vm652_vm1, %v734_v62, %v733_v59  ;;  %v737_v60 = vsel %vm652_vm1, %v736_v54, %v1564_v10  ;;  %v612_v23 = vsub.s32 0, %v610_v63 }
 0x121   :  { %v906_v30 = vshll.u32 %v866_v55, 8  ;;  %v738_v25 = vsel %vm1622_vm3, %v1397_v5, %v735_v21  ;;  %v874_v26 = vshrl.u32 %v1117_v7, %v873_v28  ;;  %v889_v38 = vor.u32 %v888_v19, %v887_v16 }
 0x122   :  { %v758_v37 = vshrl.u32 %v757_v18, 23  ;;  %1078 = vcosq.f32 %v738_v25  ;;  %v1003_v27 = vmin.u32 %v612_v23, %v610_v63  ;;  %vm890_vm4 = vcmp.lt.s32.totalorder %v871_v36, 1 }
 0x123   :  { %vm893_vm5 = vcmp.lt.s32.totalorder %v871_v36, 4  ;;  %1080 = vsinq.f32 %v738_v25  ;;  %v898_v42 = vsel %vm890_vm4, %v877_v2, %v880_v47  ;;  %vm891_vm6 = vcmp.lt.s32.totalorder %v871_v36, 2 }
 0x124   :  { %v895_v41 = vsel %vm893_vm5, %v883_v56, 2102212464  ;;  %v899_v44 = vsel %vm893_vm5, %v886_v6, 920167782  ;;  %v614_v48 = vclz %v1003_v27  ;;  %vm892_vm7 = vcmp.lt.s32.totalorder %v871_v36, 3 }
 0x125   :  { %v894_v10 = vsel %vm890_vm4, %v874_v26, %v877_v2  ;;  %v896_v8 = vsel %vm892_vm7, %v880_v47, %v895_v41  ;;  %v900_v33 = vsel %vm892_vm7, %v883_v56, %v899_v44  ;;  %v902_v34 = vsel %vm890_vm4, %v880_v47, %v883_v56 }
 0x126   :  { %v903_v43 = vsel %vm893_vm5, %v889_v38, 1326507024  ;;  %v739_v14 = vsel %vm1622_vm3, 0, %v737_v60  ;;  %v1004_v9 = vadd.s32 4294967294, %v614_v48  ;;  %v901_v51 = vsel %vm891_vm6, %v898_v42, %v900_v33 }
 0x127   :  { %v904_v39 = vsel %vm892_vm7, %v886_v6, %v903_v43  ;;  %v897_v54 = vsel %vm891_vm6, %v894_v10, %v896_v8  ;;  %v1654_v28 = vmul.u32.u64.low %v906_v30, %v901_v51  ;;  %v1655_v45 = vmul.u32.u64.high %v906_v30, %v901_v51, %v1654_v28 }
 0x128   :  { %v905_v55 = vsel %vm891_vm6, %v902_v34, %v904_v39  ;;  %vm1005_vm8 = vcmp.lt.s32.totalorder %v1004_v9, 0  ;;  %v1010_v52 = vadd.s32 4294967169, %v758_v37  ;;  %v743_v29 = vadd.s32 3, %v739_v14 }
 0x129   :  { %v1658_v31 = vmul.u32.u64.low %v906_v30, %v905_v55  ;;  %v1659_v20 = vmul.u32.u64.high %v906_v30, %v905_v55, %v1658_v31  ;;  %v617_v35 = vsel %vm1005_vm8, 0, %v1004_v9  ;;  %v602_v53 = vadd.s32 %v1596_v12, %v1602_v46 }
 0x12a   :  { %v618_v18 = vsub.s32 32, %v617_v35  ;;  %v622_v59 = vsub.s32 4294967266, %v617_v35  ;;  %v764_v40 = vadd.s32 1, %v1010_v52  ;;  %v913_v57 = vmul.u32 %v906_v30, %v897_v54 }
 0x12b   :  { %v916_v1 = vadd.s32 1, %v1655_v45  ;;  %v754_v36 = vand.u32 2147483647, %v1618_v50  ;;  %v619_v49 = vshll.u32 %v610_v63, %v617_v35  ;;  %vm915_vm10 = vc.u32 %v1659_v20, %v1654_v28 }
 0x12c   :  { %v620_v22 = vshrl.u32 %v602_v53, %v618_v18  ;;  %v623_v61 = vadd.s32 127, %v622_v59  ;;  %v744_v62 = vand.u32 3, %v743_v29  ;;  %vm765_vm9 = vcmp.gt.s32.totalorder %v764_v40, 0 }
 0x12d   :  { %v917_v2 = vsel %vm915_vm10, %v916_v1, %v1655_v45  ;;  %v766_v56 = vsel %vm765_vm9, %v764_v40, 0  ;;  %vm742_vm11 = vweird.f32 %v1397_v5  ;;  %vm548_vm12 = vcmp.lt.s32.totalorder %v1492_v58, 0 }
 0x12e   :  { %v621_v47 = vor.u32 %v620_v22, %v619_v49  ;;  %v624_v12 = vshll.u32 %v623_v61, 23  ;;  %v918_v46 = vadd.s32 %v917_v2, %v913_v57  ;;  %v632_v63 = vsub.s32 4, %v1629_v0 }
 0x12f   :  { %v1079_v6 = vpop.eup %1078  ;;  %v768_v16 = vand.u32 31, %v766_v56  ;;  %vm1673_vm13 = vcmp.le.f32.partialorder %v546_v32, 0.7853982  ;;  %v761_v25 = vand.u32 8388607, %v754_v36  ;;  %vm746_vm14 = vcmp.eq.s32.totalorder %v744_v62, 0 }
 0x130   :  { %v1081_v19 = vpop.eup %1080  ;;  %v750_v21 = vxor.u32 2147483648, %v1079_v6  ;;  %v625_v23 = vor.u32 4788187, %v624_v12  ;;  %v919_v30 = vadd.s32 536870912, %v918_v46  ;;  %vm749_vm15 = vcmp.eq.s32.totalorder %v744_v62, 2 }
 0x131   :  { %v747_v26 = vxor.u32 2147483648, %v1081_v19  ;;  %v769_v38 = vsub.s32 32, %v768_v16  ;;  %v628_v41 = vcvt.s32.f32 %v621_v47  ;;  %vm745_vm0 = vcmp.lt.s32.totalorder %v744_v62, 2 }
 0x132   :  { %v751_v37 = vsel %vm749_vm15, %v750_v21, %v1081_v19  ;;  %v626_v27 = vand.u32 2147483647, %v625_v23  ;;  %v1679_v42 = vshrl.u32 %v919_v30, 30  ;;  %v633_v32 = vsel %vm548_vm12, %v632_v63, %v1629_v0 }
 0x133   :  { %v748_v44 = vsel %vm746_vm14, %v1079_v6, %v747_v26  ;;  %v772_v48 = vshrl.u32 %v1118_v11, %v769_v38  ;;  %v762_v34 = vor.u32 8388608, %v761_v25  ;;  %v771_v14 = vshll.u32 %v1117_v7, %v768_v16 }
 0x134   :  { %v752_v10 = vsel %vm745_vm0, %v748_v44, %v751_v37  ;;  %v629_v8 = vmul.f32 %v628_v41, %v626_v27  ;;  %v921_v33 = vshll.u32 %v1679_v42, 30  ;;  %v775_v9 = vshrl.u32 %v1119_v13, %v769_v38 }
 0x135   :  { %v753_v43 = vsel %vm742_vm11, nan, %v752_v10  ;;  %v778_v51 = vshrl.u32 %v1120_v15, %v769_v38  ;;  %v767_v0 = vshrl.u32 %v766_v56, 5  ;;  %v774_v55 = vshll.u32 %v1118_v11, %v768_v16 }
 0x136   :  { %967 = vst [vmem:[#allocation2 + $0x28] sm:$0xff] %v753_v43  ;;  %v630_v39 = vxor.u32 2147483648, %v629_v8  ;;  %v922_v54 = vsub.s32 %v918_v46, %v921_v33  ;;  %v773_v45 = vor.u32 %v772_v48, %v771_v14  ;;  %v777_v31 = vshll.u32 %v1119_v13, %v768_v16 }
 0x137   :  { %v780_v52 = vshll.u32 %v1120_v15, %v768_v16  ;;  %v781_v5 = vshrl.u32 %v1121_v17, %v769_v38  ;;  %v783_v53 = vshll.u32 %v1121_v17, %v768_v16  ;;  %v784_v18 = vshrl.u32 %v1122_v24, %v769_v38 }
 0x138   :  { %v631_v29 = vsel %vm548_vm12, %v630_v39, %v629_v8  ;;  %v924_v35 = vsub.s32 0, %v922_v54  ;;  %v776_v11 = vor.u32 %v775_v9, %v774_v55  ;;  %v779_v40 = vor.u32 %v778_v51, %v777_v31 }
 0x139   :  { %v634_v59 = vsel %vm1673_vm13, %v1492_v58, %v631_v29  ;;  %v782_v57 = vor.u32 %v781_v5, %v780_v52  ;;  %v785_v15 = vor.u32 %v784_v18, %v783_v53  ;;  %v635_v1 = vsel %vm1673_vm13, 0, %v633_v32 }
 0x13a   :  { %1082 = vcosq.f32 %v634_v59  ;;  %v1015_v13 = vmin.u32 %v924_v35, %v922_v54  ;;  %v770_v49 = vshrl.u32 %v1117_v7, %v769_v38  ;;  %v802_v22 = vshll.u32 %v762_v34, 8 }
 0x13b   :  { %1084 = vsinq.f32 %v634_v59  ;;  %vm786_vm1 = vcmp.lt.s32.totalorder %v767_v0, 1  ;;  %vm788_vm2 = vcmp.lt.s32.totalorder %v767_v0, 3  ;;  %vm789_vm3 = vcmp.lt.s32.totalorder %v767_v0, 4 }
 0x13c   :  { %v926_v17 = vclz %v1015_v13  ;;  %v791_v24 = vsel %vm789_vm3, %v779_v40, 2102212464  ;;  %v794_v61 = vsel %vm786_vm1, %v773_v45, %v776_v11  ;;  %v795_v62 = vsel %vm789_vm3, %v782_v57, 920167782 }
 0x13d   :  { %v798_v2 = vsel %vm786_vm1, %v776_v11, %v779_v40  ;;  %vm787_vm4 = vcmp.lt.s32.totalorder %v767_v0, 2  ;;  %v796_v12 = vsel %vm788_vm2, %v779_v40, %v795_v62  ;;  %v799_v46 = vsel %vm789_vm3, %v785_v15, 1326507024 }
 0x13e   :  { %v1016_v47 = vadd.s32 4294967294, %v926_v17  ;;  %v790_v56 = vsel %vm786_vm1, %v770_v49, %v773_v45  ;;  %v792_v6 = vsel %vm788_vm2, %v776_v11, %v791_v24  ;;  %v797_v63 = vsel %vm787_vm4, %v794_v61, %v796_v12 }
 0x13f   :  { %v800_v16 = vsel %vm788_vm2, %v782_v57, %v799_v46  ;;  %v1707_v19 = vmul.u32.u64.low %v802_v22, %v797_v63  ;;  %v1708_v21 = vmul.u32.u64.high %v802_v22, %v797_v63, %v1707_v19  ;;  %v639_v60 = vadd.s32 3, %v635_v1 }
 0x140   :  { %vm1017_vm5 = vcmp.lt.s32.totalorder %v1016_v47, 0  ;;  %v801_v7 = vsel %vm787_vm4, %v798_v2, %v800_v16  ;;  %v914_v26 = vadd.s32 %v1654_v28, %v1659_v20  ;;  %v793_v27 = vsel %vm787_vm4, %v790_v56, %v792_v6 }
 0x141   :  { %v929_v23 = vsel %vm1017_vm5, 0, %v1016_v47  ;;  %v1710_v30 = vmul.u32.u64.low %v802_v22, %v801_v7  ;;  %v1711_v25 = vmul.u32.u64.high %v802_v22, %v801_v7, %v1710_v30  ;;  %v812_v48 = vadd.s32 1, %v1708_v21 }
 0x142   :  { %v930_v38 = vsub.s32 32, %v929_v23  ;;  %v934_v37 = vsub.s32 4294967266, %v929_v23  ;;  %v931_v41 = vshll.u32 %v922_v54, %v929_v23  ;;  %v640_v10 = vand.u32 3, %v639_v60 }
 0x143   :  { %v809_v8 = vmul.u32 %v802_v22, %v793_v27  ;;  %vm811_vm6 = vc.u32 %v1711_v25, %v1707_v19  ;;  %vm638_vm9 = vweird.f32 %v1492_v58  ;;  %vm860_vm11 = vcmp.lt.s32.totalorder %v1568_v3, 0 }
 0x144   :  { %v932_v44 = vshrl.u32 %v914_v26, %v930_v38  ;;  %v935_v32 = vadd.s32 127, %v934_v37  ;;  %v813_v43 = vsel %vm811_vm6, %v812_v48, %v1708_v21  ;;  %vm645_vm7 = vcmp.eq.s32.totalorder %v640_v10, 2 }
 0x145   :  { %v814_v9 = vadd.s32 %v813_v43, %v809_v8  ;;  %vm642_vm8 = vcmp.eq.s32.totalorder %v640_v10, 0  ;;  %vm641_vm10 = vcmp.lt.s32.totalorder %v640_v10, 2  ;;  %v944_v59 = vsub.s32 4, %v1679_v42 }
 0x146   :  { %v933_v33 = vor.u32 %v932_v44, %v931_v41  ;;  %v936_v34 = vshll.u32 %v935_v32, 23  ;;  %vm859_vm12 = vcmp.le.f32.partialorder %v858_v4, 0.7853982  ;;  %v810_v61 = vadd.s32 %v1707_v19, %v1711_v25 }
 0x147   :  { %v1083_v14 = vpop.eup %1082  ;;  %v815_v54 = vadd.s32 536870912, %v814_v9  ;;  %v945_v58 = vsel %vm860_vm11, %v944_v59, %v1679_v42  ;;  %vm950_vm1 = vweird.f32 %v1568_v3  ;;  %vm756_vm2 = vcmp.lt.s32.totalorder %v1618_v50, 0 }
 0x148   :  { %v1085_v28 = vpop.eup %1084  ;;  %v646_v20 = vxor.u32 2147483648, %v1083_v14  ;;  %v937_v51 = vor.u32 4788187, %v936_v34  ;;  %v940_v45 = vcvt.s32.f32 %v933_v33  ;;  %v947_v49 = vsel %vm859_vm12, 0, %v945_v58 }
 0x149   :  { %v643_v39 = vxor.u32 2147483648, %v1085_v28  ;;  %v816_v52 = vshrl.u32 %v815_v54, 30  ;;  %v951_v17 = vadd.s32 3, %v947_v49  ;;  %vm755_vm3 = vcmp.le.f32.partialorder %v754_v36, 0.7853982 }
 0x14a   :  { %v647_v0 = vsel %vm645_vm7, %v646_v20, %v1085_v28  ;;  %v938_v55 = vand.u32 2147483647, %v937_v51  ;;  %vm846_vm7 = vweird.f32 %v1618_v50 }
 0x14b   :  { %v644_v31 = vsel %vm642_vm8, %v1083_v14, %v643_v39  ;;  %v817_v53 = vshll.u32 %v816_v52, 30  ;;  %v952_v4 = vand.u32 3, %v951_v17  ;;  %v840_v27 = vsub.s32 4, %v816_v52 }
 0x14c   :  { %v648_v5 = vsel %vm641_vm10, %v644_v31, %v647_v0  ;;  %v941_v29 = vmul.f32 %v940_v45, %v938_v55 }
 0x14d   :  { %v649_v35 = vsel %vm638_vm9, nan, %v648_v5  ;;  %v818_v11 = vsub.s32 %v814_v9, %v817_v53  ;;  %vm957_vm14 = vcmp.eq.s32.totalorder %v952_v4, 2  ;;  %vm954_vm15 = vcmp.eq.s32.totalorder %v952_v4, 0 }
 0x14e   :  { %966 = vst [vmem:[#allocation2 + $0x20] sm:$0xff] %v649_v35  ;;  %v942_v18 = vxor.u32 2147483648, %v941_v29  ;;  %vm953_vm0 = vcmp.lt.s32.totalorder %v952_v4, 2  ;;  %v841_v32 = vsel %vm756_vm2, %v840_v27, %v816_v52 }
 0x14f   :  { %v820_v13 = vsub.s32 0, %v818_v11  ;;  %v843_v48 = vsel %vm755_vm3, 0, %v841_v32 }
 0x150   :  { %v943_v40 = vsel %vm860_vm11, %v942_v18, %v941_v29  ;;  %v847_v10 = vadd.s32 3, %v843_v48 }
 0x151   :  { %v946_v57 = vsel %vm859_vm12, %v1568_v3, %v943_v40  ;;  %v1011_v15 = vmin.u32 %v820_v13, %v818_v11 }
 0x152   :  { %1086 = vcosq.f32 %v946_v57  ;;  %v848_v3 = vand.u32 3, %v847_v10 }
 0x153   :  { %1088 = vsinq.f32 %v946_v57  ;;  %v822_v1 = vclz %v1011_v15 }
 0x154   :  { %vm853_vm4 = vcmp.eq.s32.totalorder %v848_v3, 2  ;;  %vm850_vm5 = vcmp.eq.s32.totalorder %v848_v3, 0  ;;  %vm849_vm6 = vcmp.lt.s32.totalorder %v848_v3, 2 }
 0x155   :  { %v1012_v22 = vadd.s32 4294967294, %v822_v1 }
 0x157   :  { %vm1013_vm13 = vcmp.lt.s32.totalorder %v1012_v22, 0 }
 0x158   :  { %v825_v24 = vsel %vm1013_vm13, 0, %v1012_v22 }
 0x159   :  { %v826_v62 = vsub.s32 32, %v825_v24  ;;  %v830_v2 = vsub.s32 4294967266, %v825_v24  ;;  %v827_v47 = vshll.u32 %v818_v11, %v825_v24 }
 0x15b   :  { %v828_v12 = vshrl.u32 %v810_v61, %v826_v62  ;;  %v831_v46 = vadd.s32 127, %v830_v2 }
 0x15d   :  { %v829_v6 = vor.u32 %v828_v12, %v827_v47  ;;  %v832_v63 = vshll.u32 %v831_v46, 23 }
 0x15f   :  { %v1087_v56 = vpop.eup %1086  ;;  %v833_v21 = vor.u32 4788187, %v832_v63  ;;  %v836_v19 = vcvt.s32.f32 %v829_v6 }
 0x160   :  { %v1089_v42 = vpop.eup %1088  ;;  %v958_v16 = vxor.u32 2147483648, %v1087_v56 }
 0x161   :  { %v955_v7 = vxor.u32 2147483648, %v1089_v42  ;;  %v834_v30 = vand.u32 2147483647, %v833_v21 }
 0x162   :  { %v959_v60 = vsel %vm957_vm14, %v958_v16, %v1089_v42 }
 0x163   :  { %v956_v23 = vsel %vm954_vm15, %v1087_v56, %v955_v7  ;;  %v837_v38 = vmul.f32 %v836_v19, %v834_v30 }
 0x164   :  { %v960_v25 = vsel %vm953_vm0, %v956_v23, %v959_v60 }
 0x165   :  { %v961_v26 = vsel %vm950_vm1, nan, %v960_v25  ;;  %v838_v37 = vxor.u32 2147483648, %v837_v38 }
 0x166   :  { %969 = vst [vmem:[#allocation2 + $0x38] sm:$0xff] %v961_v26 }
 0x167   :  { %v839_v41 = vsel %vm756_vm2, %v838_v37, %v837_v38 }
 0x168   :  { %v842_v44 = vsel %vm755_vm3, %v1618_v50, %v839_v41 }
 0x169   :  { %1090 = vcosq.f32 %v842_v44 }
 0x16a   :  { %1092 = vsinq.f32 %v842_v44 }
 0x176   :  { %v1091_v8 = vpop.eup %1090 }
 0x177   :  { %v1093_v33 = vpop.eup %1092  ;;  %v854_v34 = vxor.u32 2147483648, %v1091_v8 }
 0x178   :  { %v851_v43 = vxor.u32 2147483648, %v1093_v33 }
 0x179   :  { %v855_v14 = vsel %vm853_vm4, %v854_v34, %v1093_v33 }
 0x17a   :  { %v852_v36 = vsel %vm850_vm5, %v1091_v8, %v851_v43 }
 0x17b   :  { %v856_v9 = vsel %vm849_vm6, %v852_v36, %v855_v14 }
 0x17c   :  { %v857_v28 = vsel %vm846_vm7, nan, %v856_v9 }
 0x17d   :  { %968 = vst [vmem:[#allocation2 + $0x30] sm:$0xff] %v857_v28 }
 0x17e   :  { %1105 = shalt.err (!%p1102_p4)
}
 0x17f   :  { %s1124_s14 = smov 128   ;;  %s1125_s15 = smov 8  }
 0x180   :  { %981 = dma.vmem_to_hbm [thread:$0]  %s976_s12, 1024, %s1738_s2, [#allocation3], %s1124_s14, %s1124_s14, %s1125_s15  }
 0x181   :  { %1114 = dma.done.wait [#allocation3], 1024  }
 0x182   :  { %1115 = vsyncadd [#allocation3], 4294966272 }
 0x183   :  { %985 = vsyncpa [#allocation3], 1 }

</bundles_post_ra>
